<compile_context>
chip_gen: v7x
topology: tpu7x:2x2x1
jax: 0.10.0
libtpu: 0.0.40
codegen_flags: <defaults>
</compile_context>

<pallas_src>
import functools
import math

import jax
import jax.numpy as jnp
from jax.experimental import pallas as pl
from jax.experimental.pallas import tpu as pltpu

_LANE = 128
_TR_MAX = 256                      # max rows per tile
_TL_MAX = 8192                     # max reduction elements per tile (bounds unroll)
_TILE_BYTES = 2 * 1024 * 1024      # per-input, per-pipeline-buffer byte budget
_VMEM_LIMIT = 32 * 1024 * 1024     # comfortable on every generation incl. v7x


def _round_up(x, m):
    return ((x + m - 1) // m) * m


def _sublane_multiple(*dtypes):
    # f32 -> 8, bf16/f16 -> 16, int8/fp8 -> 32 for the second-to-last block dim.
    itemsize = min(jnp.dtype(d).itemsize for d in dtypes)
    return max(8, 32 // max(1, itemsize))


def _pick_tr(rows, sub, tr):
    """Row tile: multiple of the sublane granularity, >=2 blocks when possible."""
    if tr is not None:
        return rows if tr >= rows else max(sub, _round_up(int(tr), sub))
    if rows <= sub:
        return rows
    # Aim for at least two row blocks so both v7x TensorCores get work.
    return max(sub, min(_TR_MAX, _round_up(pl.cdiv(rows, 2), sub)))


def _pick_tl(L, TR, itemsize, tl):
    """Reduction tile: lane-aligned, byte-budgeted, prefers exact divisors of L."""
    Lp = _round_up(L, _LANE)
    if tl is not None:
        return min(_round_up(int(tl), _LANE), Lp)
    budget = (_TILE_BYTES // (TR * itemsize)) // _LANE * _LANE
    budget = max(_LANE, min(_TL_MAX, budget))
    if Lp <= budget:
        return Lp
    if L % _LANE == 0:
        total_g = L // _LANE
        max_g = budget // _LANE
        best = 1
        for d in range(1, max_g + 1):
            if total_g % d == 0:
                best = d
        if 2 * best >= max_g:          # dividing tile is big enough -> no tail mask
            return best * _LANE
    return budget                       # accept masking on the final tile only


# ---------------------------------------------------------------------------
# General kernel: (R, L) slab, grid = (R//TR, L//TL), L >= 128 (or 128%L != 0).
# ---------------------------------------------------------------------------
def _dice_reduce_kernel(x_ref, t_ref, dice_ref, inter_ref, denom_ref, *,
                        threshold, epsilon, L, TL, nL):
    G = TL // _LANE
    last = nL - 1
    k = pl.program_id(1)

    @pl.when(k == 0)
    def _init():
        inter_ref[...] = jnp.zeros_like(inter_ref)
        denom_ref[...] = jnp.zeros_like(denom_ref)

    def accumulate(last_tile):
        # Deferred cross-lane reduce: only 128-aligned ref slices + VALU adds
        # in the steady state; the XLU reduce happens once in finalize().
        ip = inter_ref[...]
        dp = denom_ref[...]
        for g in range(G):
            if last_tile:
                start = last * TL + g * _LANE        # static for the last tile
                if start >= L:
                    break                            # group is pure padding
                n_valid = min(_LANE, L - start)
            else:
                n_valid = _LANE
            sl = slice(g * _LANE, (g + 1) * _LANE)
            xg = x_ref[:, sl].astype(jnp.float32)    # f32 compare for parity
            tg = t_ref[:, sl].astype(jnp.float32)
            thr = xg >= threshold
            if n_valid < _LANE:
                lane = jax.lax.broadcasted_iota(jnp.int32, xg.shape, 1)
                valid = lane < n_valid
                thr = jnp.logical_and(thr, valid)
                tg = jnp.where(valid, tg, 0.0)
            ip = ip + jnp.where(thr, tg, 0.0)                 # sum(x_th * t)
            dp = dp + (jnp.where(thr, 1.0, 0.0) + tg)         # sum(x_th) + sum(t)
        inter_ref[...] = ip
        denom_ref[...] = dp

    def finalize():
        inter = jnp.sum(inter_ref[...], axis=-1, keepdims=True)
        denom = jnp.sum(denom_ref[...], axis=-1, keepdims=True)
        dice_ref[...] = (2.0 * inter + epsilon) / (denom + epsilon)

    tail_needed = (L % TL) != 0

    if nL == 1:
        accumulate(last_tile=tail_needed)
        finalize()
    elif not tail_needed:
        accumulate(last_tile=False)

        @pl.when(k == last)
        def _fin():
            finalize()
    else:
        @pl.when(k != last)
        def _steady():                  # unmasked fast path
            accumulate(last_tile=False)

        @pl.when(k == last)
        def _tail():                    # masked path only on the final L tile
            accumulate(last_tile=True)
            finalize()


def _dice_rows_general(x2, t2, R, L, threshold, epsilon, sub, itemsize, tr, tl):
    TR = _pick_tr(R, sub, tr)
    TL = _pick_tl(L, TR, itemsize, tl)
    nR = pl.cdiv(R, TR)
    nL = pl.cdiv(L, TL)

    kernel = functools.partial(
        _dice_reduce_kernel,
        threshold=float(threshold), epsilon=float(epsilon),
        L=int(L), TL=int(TL), nL=int(nL))

    dice_rows = pl.pallas_call(
        kernel,
        out_shape=jax.ShapeDtypeStruct((R, 1), jnp.float32),
        grid_spec=pltpu.PrefetchScalarGridSpec(
            num_scalar_prefetch=0,
            grid=(nR, nL),
            in_specs=[pl.BlockSpec((TR, TL), lambda r, k: (r, k)),
                      pl.BlockSpec((TR, TL), lambda r, k: (r, k))],
            out_specs=pl.BlockSpec((TR, 1), lambda r, k: (r, 0)),
            scratch_shapes=[pltpu.VMEM((TR, _LANE), jnp.float32),
                            pltpu.VMEM((TR, _LANE), jnp.float32)],
        ),
        compiler_params=pltpu.CompilerParams(
            dimension_semantics=("parallel", "arbitrary"),
            vmem_limit_bytes=_VMEM_LIMIT,
        ),
    )(x2, t2)
    return dice_rows[:, 0]


# ---------------------------------------------------------------------------
# Packed kernel for short trailing dims: L < 128 and 128 % L == 0.
# g = 128 // L original rows are packed per lane row; the per-row segmented
# sums over L-lane groups run on the otherwise-idle MXU via a block-diagonal
# ones matrix, keeping the lanes fully utilized.
# ---------------------------------------------------------------------------
def _dice_packed_kernel(seg_ref, x_ref, t_ref, dice_ref, *, threshold, epsilon):
    x = x_ref[...].astype(jnp.float32)       # (TR, 128)
    t = t_ref[...].astype(jnp.float32)
    seg = seg_ref[...]                       # (128, g) block-diagonal ones, f32
    thr = x >= threshold
    x_th = jnp.where(thr, 1.0, 0.0)
    inter = jnp.dot(jnp.where(thr, t, 0.0), seg,
                    preferred_element_type=jnp.float32)          # (TR, g)
    denom = jnp.dot(x_th + t, seg, preferred_element_type=jnp.float32)
    dice_ref[...] = (2.0 * inter + epsilon) / (denom + epsilon)


def _dice_rows_packed(x2, t2, R, L, threshold, epsilon, sub, tr):
    g = _LANE // L
    Rp = _round_up(R, g)
    if Rp != R:
        pad = ((0, Rp - R), (0, 0))
        x2 = jnp.pad(x2, pad)
        t2 = jnp.pad(t2, pad)
    Rq = Rp // g
    xq = jnp.reshape(x2, (Rq, _LANE))
    tq = jnp.reshape(t2, (Rq, _LANE))

    TR = _pick_tr(Rq, sub, tr)
    nR = pl.cdiv(Rq, TR)

    seg = (jnp.arange(_LANE, dtype=jnp.int32)[:, None] // L
           == jnp.arange(g, dtype=jnp.int32)[None, :]).astype(jnp.float32)

    kernel = functools.partial(_dice_packed_kernel,
                               threshold=float(threshold),
                               epsilon=float(epsilon))

    dice_q = pl.pallas_call(
        kernel,
        out_shape=jax.ShapeDtypeStruct((Rq, g), jnp.float32),
        grid_spec=pltpu.PrefetchScalarGridSpec(
            num_scalar_prefetch=0,
            grid=(nR,),
            in_specs=[pl.BlockSpec((_LANE, g), lambda r: (0, 0)),
                      pl.BlockSpec((TR, _LANE), lambda r: (r, 0)),
                      pl.BlockSpec((TR, _LANE), lambda r: (r, 0))],
            out_specs=pl.BlockSpec((TR, g), lambda r: (r, 0)),
        ),
        compiler_params=pltpu.CompilerParams(
            dimension_semantics=("parallel",),
            vmem_limit_bytes=_VMEM_LIMIT,
        ),
    )(seg, xq, tq)
    return jnp.reshape(dice_q, (Rp,))[:R]


# ---------------------------------------------------------------------------
# Public wrapper mirroring torch hard_dice / HardDice.
# ---------------------------------------------------------------------------
def hard_dice_pallas(input_, target, threshold=0.5, reduction="mean",
                     epsilon=1e-08, tr=None, tl=None):
    if input_.shape != target.shape:
        raise ValueError("input_ and target must have the same shape")
    if reduction not in ("none", "mean", "sum"):
        raise NotImplementedError(reduction)
    # TODO(synk): data-dependent ValueError for non-binary targets (eager
    # target.max/min/unique check in the reference) has no clean Pallas
    # equivalent; it is omitted here.

    lead = input_.shape[:-1]
    L = int(input_.shape[-1])
    R = int(math.prod(lead)) if lead else 1

    x2 = jnp.reshape(input_, (R, L))       # stream in native dtype, no upcast
    t2 = jnp.reshape(target, (R, L))

    sub = _sublane_multiple(x2.dtype, t2.dtype)
    itemsize = max(jnp.dtype(x2.dtype).itemsize, jnp.dtype(t2.dtype).itemsize)

    if (tl is None) and (L < _LANE) and (_LANE % L == 0):
        dice = _dice_rows_packed(x2, t2, R, L, threshold, epsilon, sub, tr)
    else:
        dice = _dice_rows_general(x2, t2, R, L, threshold, epsilon, sub,
                                  itemsize, tr, tl)

    if reduction == "none":
        return dice.reshape(lead)
    if reduction == "mean":
        return jnp.mean(dice)
    return jnp.sum(dice)


class HardDice:
    """Mirror of the PyTorch HardDice module (no learnable params)."""

    def __init__(self, threshold=0.5, reduction="mean"):
        self.threshold = threshold
        self.reduction = reduction

    def __call__(self, input_, target):
        return hard_dice_pallas(input_, target,
                                threshold=self.threshold,
                                reduction=self.reduction,
                                epsilon=1e-08)


def _hard_dice_ref(input_, target, threshold=0.5, reduction="mean",
                   epsilon=1e-08):
    x = jnp.asarray(input_, jnp.float32)
    t = jnp.asarray(target, jnp.float32)
    x_th = jnp.where(x >= threshold, 1.0, 0.0)
    inter = jnp.sum(x_th * t, axis=-1)
    in_norm = jnp.sum(x_th, axis=-1)
    t_norm = jnp.sum(t, axis=-1)
    dice = (2.0 * inter + epsilon) / (in_norm + t_norm + epsilon)
    if reduction == "mean":
        dice = jnp.mean(dice)
    elif reduction == "sum":
        dice = jnp.sum(dice)
    return dice


if __name__ == "__main__":
    key = jax.random.PRNGKey(0)
    k1, k2, k3, k4, k5, k6, k7, k8 = jax.random.split(key, 8)

    # 1) NCHW-style probability map, trailing dim 16 (< 128) -> packed lane path.
    x = jax.random.uniform(k1, (2, 4, 16, 16), dtype=jnp.float32)
    t = (jax.random.uniform(k2, (2, 4, 16, 16)) > 0.5).astype(jnp.float32)
    module = HardDice(threshold=0.5, reduction="mean")
    dice = jax.block_until_ready(module(x, t))
    ref = _hard_dice_ref(x, t, 0.5, "mean")
    assert jnp.allclose(dice, ref, atol=1e-5, rtol=1e-5), (dice, ref)
    for red in ("none", "sum"):
        out = jax.block_until_ready(hard_dice_pallas(x, t, 0.5, red))
        refr = _hard_dice_ref(x, t, 0.5, red)
        assert jnp.allclose(out, refr, atol=1e-5, rtol=1e-5), (red, out, refr)

    # 2) General path: row tiling + masked lane tail (L = 200) via overrides.
    x2 = jax.random.uniform(k3, (4, 21, 200), dtype=jnp.float32)
    t2 = (jax.random.uniform(k4, (4, 21, 200)) > 0.5).astype(jnp.float32)
    for red in ("none", "mean", "sum"):
        out = jax.block_until_ready(
            hard_dice_pallas(x2, t2, 0.5, red, tr=8, tl=128))
        refr = _hard_dice_ref(x2, t2, 0.5, red)
        assert jnp.allclose(out, refr, atol=1e-5, rtol=1e-5), (red, out, refr)

    # 3) Multi L-tile accumulation with default byte-budgeted tiles (no tail).
    x3 = jax.random.uniform(k5, (8, 16384), dtype=jnp.float32)
    t3 = (jax.random.uniform(k6, (8, 16384)) > 0.5).astype(jnp.float32)
    out3 = jax.block_until_ready(hard_dice_pallas(x3, t3, 0.5, "mean"))
    ref3 = _hard_dice_ref(x3, t3, 0.5, "mean")
    assert jnp.allclose(out3, ref3, atol=1e-5, rtol=1e-5), (out3, ref3)

    # 4) bf16 inputs stream natively; compare/accumulate in f32 inside the kernel.
    x4 = jax.random.uniform(k7, (2, 64, 1024)).astype(jnp.bfloat16)
    t4 = (jax.random.uniform(k8, (2, 64, 1024)) > 0.5).astype(jnp.bfloat16)
    out4 = jax.block_until_ready(hard_dice_pallas(x4, t4, 0.5, "mean"))
    ref4 = _hard_dice_ref(x4, t4, 0.5, "mean")
    assert jnp.allclose(out4, ref4, atol=1e-4, rtol=1e-4), (out4, ref4)

    print("KERNEL_OK")
</pallas_src>

<mosaic_0001>
module attributes {stable_mosaic.version = 11 : i64} {
  func.func @_dice_packed_kernel(%arg0: i32, %arg1: memref<128x8xf32, #tpu.memory_space<vmem>>, %arg2: memref<8x128xf32, #tpu.memory_space<vmem>>, %arg3: memref<8x128xf32, #tpu.memory_space<vmem>>, %arg4: memref<8x8xf32, #tpu.memory_space<vmem>>) attributes {dimension_semantics = [#tpu.dimension_semantics<parallel>], iteration_bounds = array<i64: 2>, scalar_prefetch = 0 : i64, scratch_operands = 0 : i64, tpu.core_type = #tpu.core_type<tc>, window_params = [{pipeline_mode = #tpu.pipeline_mode<synchronous>, transform_indices = @transform_0, window_bounds = array<i64: 128, 8>}, {transform_indices = @transform_1, window_bounds = array<i64: 8, 128>}, {transform_indices = @transform_2, window_bounds = array<i64: 8, 128>}, {transform_indices = @transform_3, window_bounds = array<i64: 8, 8>}]} {
    %c0 = arith.constant 0 : index
    %c0_0 = arith.constant 0 : index
    %0 = vector.load %arg2[%c0, %c0_0] : memref<8x128xf32, #tpu.memory_space<vmem>>, vector<8x128xf32>
    %c0_1 = arith.constant 0 : index
    %c0_2 = arith.constant 0 : index
    %1 = vector.load %arg3[%c0_1, %c0_2] : memref<8x128xf32, #tpu.memory_space<vmem>>, vector<8x128xf32>
    %c0_3 = arith.constant 0 : index
    %c0_4 = arith.constant 0 : index
    %2 = vector.load %arg1[%c0_3, %c0_4] : memref<128x8xf32, #tpu.memory_space<vmem>>, vector<128x8xf32>
    %cst = arith.constant 5.000000e-01 : f32
    %3 = vector.broadcast %cst : f32 to vector<8x128xf32>
    %4 = arith.cmpf oge, %0, %3 : vector<8x128xf32>
    %cst_5 = arith.constant 1.000000e+00 : f32
    %cst_6 = arith.constant 0.000000e+00 : f32
    %5 = vector.broadcast %cst_5 : f32 to vector<8x128xf32>
    %6 = vector.broadcast %cst_6 : f32 to vector<8x128xf32>
    %7 = arith.select %4, %5, %6 : vector<8x128xi1>, vector<8x128xf32>
    %cst_7 = arith.constant 0.000000e+00 : f32
    %8 = vector.broadcast %cst_7 : f32 to vector<8x128xf32>
    %9 = arith.select %4, %1, %8 : vector<8x128xi1>, vector<8x128xf32>
    %cst_8 = arith.constant dense<0.000000e+00> : vector<8x8xf32>
    %10 = tpu.matmul %9, %2, %cst_8 {dimension_numbers = #tpu.dot_dimension_numbers<[1], [0], [0], [1], [0, 0, 1, 1], [], []>} : vector<8x128xf32>, vector<128x8xf32>, vector<8x8xf32> -> vector<8x8xf32>
    %11 = arith.addf %7, %1 : vector<8x128xf32>
    %cst_9 = arith.constant dense<0.000000e+00> : vector<8x8xf32>
    %12 = tpu.matmul %11, %2, %cst_9 {dimension_numbers = #tpu.dot_dimension_numbers<[1], [0], [0], [1], [0, 0, 1, 1], [], []>} : vector<8x128xf32>, vector<128x8xf32>, vector<8x8xf32> -> vector<8x8xf32>
    %cst_10 = arith.constant 2.000000e+00 : f32
    %13 = vector.broadcast %cst_10 : f32 to vector<8x8xf32>
    %14 = arith.mulf %13, %10 : vector<8x8xf32>
    %cst_11 = arith.constant 9.99999993E-9 : f32
    %15 = vector.broadcast %cst_11 : f32 to vector<8x8xf32>
    %16 = arith.addf %14, %15 : vector<8x8xf32>
    %cst_12 = arith.constant 9.99999993E-9 : f32
    %17 = vector.broadcast %cst_12 : f32 to vector<8x8xf32>
    %18 = arith.addf %12, %17 : vector<8x8xf32>
    %19 = arith.divf %16, %18 : vector<8x8xf32>
    %c0_13 = arith.constant 0 : index
    %c0_14 = arith.constant 0 : index
    %20 = vector.load %arg4[%c0_13, %c0_14] : memref<8x8xf32, #tpu.memory_space<vmem>>, vector<8x8xf32>
    tpu.vector_store %arg4[%c0_13, %c0_14], %19 {strides = array<i32>} : memref<8x8xf32, #tpu.memory_space<vmem>>, vector<8x8xf32>,
    return
  }
  func.func @transform_0(%arg0: i32) -> (i32, i32) {
    %c0_i32 = arith.constant 0 : i32
    %c0_i32_0 = arith.constant 0 : i32
    %c0_i32_1 = arith.constant 0 : i32
    return %c0_i32, %c0_i32_0 : i32, i32
  }
  func.func @transform_1(%arg0: i32) -> (i32, i32) {
    %c0_i32 = arith.constant 0 : i32
    %c0_i32_0 = arith.constant 0 : i32
    return %arg0, %c0_i32 : i32, i32
  }
  func.func @transform_2(%arg0: i32) -> (i32, i32) {
    %c0_i32 = arith.constant 0 : i32
    %c0_i32_0 = arith.constant 0 : i32
    return %arg0, %c0_i32 : i32, i32
  }
  func.func @transform_3(%arg0: i32) -> (i32, i32) {
    %c0_i32 = arith.constant 0 : i32
    %c0_i32_0 = arith.constant 0 : i32
    return %arg0, %c0_i32 : i32, i32
  }
}

</mosaic_0001>

<bundles_post_ra>
// kernel: tpu_custom_call.1
= control target key start
LH: loop header
LB: loop body
LE: loop exit
PB: predicated region body
PF: predicated region fallthrough
CT: control target
= control target key end

     0   :  { %s623_s12 = smov 0   ;;  %s716_s0 = inlined_call_operand.vmem [shape: f32[128,8], index: 0, kind: input, shape index: {}]   ;;  %s717_s1 = inlined_call_operand.vmem [shape: f32[16,128], index: 1, kind: input, shape index: {}]   ;;  %s718_s2 = inlined_call_operand.vmem [shape: f32[16,128], index: 2, kind: input, shape index: {}]   ;;  %s719_s3 = inlined_call_operand.vmem [shape: f32[16,8], index: 3, kind: output, shape index: {}]  }
   0x1 LB: > { %s416_s13 = sadd.s32 4294967295, %s598_s12   ;;  %p420_p0 = scmp.ge.s32.totalorder %s598_s12, 1  ;;  %s598_s12 = sphi %s623_s12, %s13_s12  }
   0x2   : > { %p145_p1 = scmp.lt.s32.totalorder %s598_s12, 3 }
   0x4   : > { %p146_p2 = pnand %p420_p0, %p145_p1 }
   0x5   : > { %v185_v0 = vld [vmem:[%s716_s0] sm:$0xff] (!%p146_p2)  ;;  %v186_v1 = vld [vmem:[%s716_s0 + $0x8] sm:$0xff] (!%p146_p2)  ;;  %v187_v2 = vld [vmem:[%s716_s0 + $0x10] sm:$0xff] (!%p146_p2)  ;;  %v600_v3 = vmov (!%p146_p2), 0.0|0.0   ;;  %vm601_vm0 = vmmov (!%p146_p2), 0   ;;  %v602_v6 = vmov (!%p146_p2), 0.0  }
   0x6   : > { %149 = sbr.rel (%p146_p2) target bundleno = 267 (0x10b), region = 32  ;;  %555 = vmatprep.subr.bf16.mxu1 (!%p146_p2), %v600_v3  ;;  %v532_v4 = vpack.c.bf16 (!%p146_p2), %v186_v1, %v185_v0  ;;  %v188_v5 = vld [vmem:[%s716_s0 + $0x18] sm:$0xff] (!%p146_p2)  ;;  %531 = vmatprep.subr.bf16.mxu0 (!%p146_p2), %v600_v3  ;;  %v189_v8 = vld [vmem:[%s716_s0 + $0x20] sm:$0xff] (!%p146_p2)  ;;  %v190_v9 = vld [vmem:[%s716_s0 + $0x28] sm:$0xff] (!%p146_p2)  ;;  %p171_p3 = scmp.lt.s32.totalorder (!%p146_p2), %s416_s13, 1  ;;  %vm349_vm2 = vcmask (!%p146_p2), 64512  }
   0x7   : > { %528 = vmatprep.mubr.msk.f32.mxu1 (!%p146_p2), %vm601_vm0, %v602_v6  ;;  %493 = vmatprep.mubr.msk.f32.mxu0 (!%p146_p2), %vm601_vm0, %v602_v6  ;;  %v535_v7 = vpack.c.bf16 (!%p146_p2), %v188_v5, %v187_v2  ;;  %v538_v10 = vpack.c.bf16 (!%p146_p2), %v190_v9, %v189_v8  ;;  %v191_v11 = vld [vmem:[%s716_s0 + $0x30] sm:$0xff] (!%p146_p2)  ;;  %v192_v12 = vld [vmem:[%s716_s0 + $0x38] sm:$0xff] (!%p146_p2)  ;;  %v193_v14 = vld [vmem:[%s716_s0 + $0x40] sm:$0xff] (!%p146_p2) }
   0x8   : > { %557 = vmatpush3.bf16.msra.mxu1 (!%p146_p2), %v532_v4  ;;  %533 = vmatpush3.bf16.msra.mxu0 (!%p146_p2), %v532_v4  ;;  %v541_v13 = vpack.c.bf16 (!%p146_p2), %v192_v12, %v191_v11  ;;  %v194_v15 = vld [vmem:[%s716_s0 + $0x48] sm:$0xff] (!%p146_p2)  ;;  %v195_v17 = vld [vmem:[%s716_s0 + $0x50] sm:$0xff] (!%p146_p2)  ;;  %v196_v18 = vld [vmem:[%s716_s0 + $0x58] sm:$0xff] (!%p146_p2) }
   0x9   : > { %558 = vmatprep.subr.bf16.mxu1 (!%p146_p2), %v600_v3  ;;  %534 = vmatprep.subr.bf16.mxu0 (!%p146_p2), %v600_v3  ;;  %v544_v16 = vpack.c.bf16 (!%p146_p2), %v194_v15, %v193_v14  ;;  %v547_v19 = vpack.c.bf16 (!%p146_p2), %v196_v18, %v195_v17  ;;  %v197_v20 = vld [vmem:[%s716_s0 + $0x60] sm:$0xff] (!%p146_p2)  ;;  %v198_v21 = vld [vmem:[%s716_s0 + $0x68] sm:$0xff] (!%p146_p2)  ;;  %v199_v24 = vld [vmem:[%s716_s0 + $0x70] sm:$0xff] (!%p146_p2) }
   0xa   : > { %v550_v23 = vpack.c.bf16 (!%p146_p2), %v198_v21, %v197_v20  ;;  %v200_v25 = vld [vmem:[%s716_s0 + $0x78] sm:$0xff] (!%p146_p2) }
   0xb   : > { %v553_v26 = vpack.c.bf16 (!%p146_p2), %v200_v25, %v199_v24 }
   0xc   : > { %560 = vmatpush3.bf16.msra.mxu1 (!%p146_p2), %v535_v7  ;;  %536 = vmatpush3.bf16.msra.mxu0 (!%p146_p2), %v535_v7 }
   0xd   : > { %561 = vmatprep.subr.bf16.mxu1 %v600_v3  ;;  %537 = vmatprep.subr.bf16.mxu0 %v600_v3  ;;  %s721_s13 = smov (!%p171_p3, %s416_s13), 1 }
   0xe   : > { %s673_s7 = sshll.u32 %s721_s13, 3 }
   0xf   : > { %s174_s16 = scalar_lea.vmem %s717_s1, %s673_s7  ;;  %s178_s26 = scalar_lea.vmem %s718_s2, %s673_s7 }
  0x10   : > { %563 = vmatpush3.bf16.msra.mxu1 %v538_v10  ;;  %539 = vmatpush3.bf16.msra.mxu0 %v538_v10  ;;  %v183_v22 = vld [vmem:[%s174_s16] sm:$0xff]  ;;  %s182_s29 = scalar_lea.vmem %s719_s3, %s673_s7 }
  0x11   : > { %564 = vmatprep.subr.bf16.mxu1 %v600_v3  ;;  %540 = vmatprep.subr.bf16.mxu0 %v600_v3  ;;  %vm201_vm1 = vcmp.ge.f32.partialorder %v183_v22, 0.5  ;;  %v184_v28 = vld [vmem:[%s178_s26] sm:$0xff] }
  0x12   : > { %v202_v27 = vsel %vm201_vm1, 1.0, %v602_v6 }
  0x13   : > { %v274_v29 = vadd.f32 %v202_v27, %v184_v28 }
  0x14   : > { %566 = vmatpush3.bf16.msra.mxu1 %v541_v13  ;;  %542 = vmatpush3.bf16.msra.mxu0 %v541_v13 }
  0x15   : > { %567 = vmatprep.subr.bf16.mxu1 %v600_v3  ;;  %543 = vmatprep.subr.bf16.mxu0 %v600_v3 }
  0x18   : > { %569 = vmatpush3.bf16.msra.mxu1 %v544_v16  ;;  %545 = vmatpush3.bf16.msra.mxu0 %v544_v16 }
  0x19   : > { %570 = vmatprep.subr.bf16.mxu1 %v600_v3  ;;  %546 = vmatprep.subr.bf16.mxu0 %v600_v3 }
  0x1c   : > { %572 = vmatpush3.bf16.msra.mxu1 %v547_v19  ;;  %548 = vmatpush3.bf16.msra.mxu0 %v547_v19 }
  0x1d   : > { %573 = vmatprep.subr.bf16.mxu1 %v600_v3  ;;  %549 = vmatprep.subr.bf16.mxu0 %v600_v3 }
  0x20   : > { %575 = vmatpush3.bf16.msra.mxu1 %v550_v23  ;;  %551 = vmatpush3.bf16.msra.mxu0 %v550_v23 }
  0x21   : > { %576 = vmatprep.subr.bf16.mxu1 %v600_v3  ;;  %552 = vmatprep.subr.bf16.mxu0 %v600_v3 }
  0x24   : > { %578 = vmatpush3.bf16.msra.mxu1 %v553_v26  ;;  %554 = vmatpush3.bf16.msra.mxu0 %v553_v26 }
  0x27   : > { %529 = vmatmul.mubr.f32.vlgmr.msra.gmra.mrb[0].mxu1 %v274_v29  ;;  %494 = vmatmul.mubr.msk.f32.vlgmr.msra.gmra.mrb[0].mxu0 %vm201_vm1, %v184_v28 }
  0xfa   : > { %v343_v30 = vpop.f32.mrb[0].mxu1  ;;  %v270_v31 = vpop.f32.mrb[0].mxu0 }
  0xfb   : > { %v344_v32 = vadd.f32 1e-08, %v343_v30  ;;  %v530_v33 = vpop.f32.mrb[1].mxu1  ;;  %v495_v34 = vpop.f32.mrb[1].mxu0  ;;  %v275_v35 = vmul.f32 2.0, %v270_v31 }
  0xfd   : > { %590 = vrcp.f32 %v344_v32  ;;  %v276_v36 = vadd.f32 1e-08, %v275_v35 }
 0x107   : > { %v591_v37 = vpop.eup %590 }
 0x108   : > { %v348_v38 = vmul.f32 %v591_v37, %v276_v36 }
 0x10a   : > { %350 = vst.msk [vmem:[%s182_s29] sm:$0xff] %vm349_vm2, %v348_v38 }
 0x10b PF: > { %s13_s12 = sadd.s32 1, %s598_s12  }
 0x10c   : > { %p10_p4 = scmp.ge.s32.totalorder %s13_s12, 4  }
 0x10e   :  { %12 = sbr.rel (!%p10_p4) target bundleno = 1 (0x1), region = 65 }

</bundles_post_ra>
